<compile_context>
chip_gen: v7x
topology: tpu7x:2x2x1
jax: 0.10.0
libtpu: 0.0.40
codegen_flags: <defaults>
</compile_context>

<pallas_src>
import functools
import math

import jax
import jax.numpy as jnp
from jax import lax
from jax.experimental import pallas as pl
from jax.experimental.pallas import tpu as pltpu

_INV_SQRT2 = 1.0 / math.sqrt(2.0)


def _gelu_exact(x):
    # F.gelu default: exact erf-based GELU.
    return 0.5 * x * (1.0 + lax.erf(x * _INV_SQRT2))


def _layernorm(x, w, b, eps=1e-5):
    mu = jnp.mean(x, axis=-1, keepdims=True)
    var = jnp.mean((x - mu) ** 2, axis=-1, keepdims=True)
    return (x - mu) * lax.rsqrt(var + eps) * w + b


# --------------------------------------------------------------------------- #
# pass 1: input LayerNorm + fused QKV projection, tiled over (batch, seq-tile) #
# --------------------------------------------------------------------------- #
def _qkv_kernel(x_ref, ln1_w_ref, ln1_b_ref, wqkv_ref, bqkv_ref,
                q_ref, k_ref, v_ref):
    x = x_ref[0]                                             # (TS, H)
    H = x.shape[-1]
    xn = _layernorm(x, ln1_w_ref[...], ln1_b_ref[...])
    qkv = jnp.dot(xn, wqkv_ref[...],
                  preferred_element_type=jnp.float32) + bqkv_ref[...]
    q_ref[0] = qkv[:, 0 * H:1 * H].astype(q_ref.dtype)
    k_ref[0] = qkv[:, 1 * H:2 * H].astype(k_ref.dtype)
    v_ref[0] = qkv[:, 2 * H:3 * H].astype(v_ref.dtype)


# --------------------------------------------------------------------------- #
# pass 2: attention + out-proj + residual/GELU + LN2 + MLP + residual/GELU,    #
#         tiled over (batch, query-block); K/V stay resident per batch element #
# --------------------------------------------------------------------------- #
def _attn_mlp_kernel(x_ref, q_ref, k_ref, v_ref,
                     wo_ref, bo_ref, ln2_w_ref, ln2_b_ref,
                     w1_ref, b1_ref, w2_ref, b2_ref,
                     o_ref, attn_scratch, *, num_heads):
    H = q_ref.shape[-1]
    hd = H // num_heads
    scale = 1.0 / math.sqrt(hd)

    # Per-head QK^T / PV; each head writes its (TQ, hd) output at its lane offset
    # in the (TQ, H) VMEM scratch, so the output projection is a single wide matmul.
    for h in range(num_heads):
        lo, hi = h * hd, (h + 1) * hd
        qh = q_ref[0, :, lo:hi] * scale                       # (TQ, hd)
        kh = k_ref[0, :, lo:hi]                               # (S,  hd)
        vh = v_ref[0, :, lo:hi]                               # (S,  hd)
        # NT contraction: no kh.T materialization.
        s = lax.dot_general(qh, kh,
                            dimension_numbers=(((1,), (1,)), ((), ())),
                            preferred_element_type=jnp.float32)   # (TQ, S)
        s = s - jnp.max(s, axis=-1, keepdims=True)
        e = jnp.exp(s)
        # EUP reciprocal + VPU multiply instead of a broadcast divide.
        p = e * pl.reciprocal(jnp.sum(e, axis=-1, keepdims=True), approx=True)
        attn_scratch[:, lo:hi] = jnp.dot(p, vh, preferred_element_type=jnp.float32)

    # Single fused output projection (K=H, N=H) + bias.
    attn = jnp.dot(attn_scratch[...], wo_ref[...],
                   preferred_element_type=jnp.float32) + bo_ref[...]

    residual = x_ref[0]                                       # (TQ, H)
    x2 = _gelu_exact(attn + residual)

    xn2 = _layernorm(x2, ln2_w_ref[...], ln2_b_ref[...])
    # TODO(synk): on v7x with large F, tile w1_t / w2_t over F-chunks (emit_pipeline).
    h1 = _gelu_exact(
        jnp.dot(xn2, w1_ref[...], preferred_element_type=jnp.float32) + b1_ref[...])
    out = _gelu_exact(
        jnp.dot(h1, w2_ref[...], preferred_element_type=jnp.float32) + b2_ref[...] + x2)
    o_ref[0] = out.astype(o_ref.dtype)


# --------------------------------------------------------------------------- #
# wrappers                                                                     #
# --------------------------------------------------------------------------- #
def _pick_tile(n, target):
    """Largest divisor of n that is <= target and a multiple of 8; else n (full dim)."""
    if n <= target:
        return n
    for t in range(target, 7, -1):
        if n % t == 0 and t % 8 == 0:
            return t
    return n


def _compiler_params(est_bytes, dims):
    # Default scoped VMEM is 16 MiB (v5e) / 32 MiB (v6e, v7x); request enough for the
    # resident weights + double-buffered tiles, clamped to 56 MiB so it also fits
    # v7x's 64 MiB physical VMEM (v5e/v6e could go up to ~100 MiB).
    limit = int(min(max(2 * est_bytes, 32 << 20), 56 << 20))
    return pltpu.CompilerParams(dimension_semantics=dims, vmem_limit_bytes=limit)


def tester_layer(x, params, num_heads, *, seq_tile=256, q_tile=256):
    B, S, H = x.shape
    F = params["w1_t"].shape[1]

    # ---- pass 1: LN1 + fused QKV projection ----
    ts = _pick_tile(S, seq_tile)
    a_plist = [params["ln1_w"], params["ln1_b"], params["wqkv_t"], params["bqkv"]]
    a_pspecs = [pl.BlockSpec(p.shape, lambda b, s, _nd=p.ndim: (0,) * _nd)
                for p in a_plist]
    a_bytes = 4 * (sum(int(p.size) for p in a_plist)
                   + 2 * (ts * H + 3 * ts * H)        # double-buffered in/out tiles
                   + 4 * ts * H)                      # live intermediates (approx)
    q, k, v = pl.pallas_call(
        _qkv_kernel,
        out_shape=(jax.ShapeDtypeStruct((B, S, H), x.dtype),) * 3,
        grid=(B, S // ts),
        in_specs=[pl.BlockSpec((1, ts, H), lambda b, s: (b, s, 0))] + a_pspecs,
        out_specs=(pl.BlockSpec((1, ts, H), lambda b, s: (b, s, 0)),) * 3,
        compiler_params=_compiler_params(a_bytes, ("parallel", "parallel")),
    )(x, *a_plist)

    # ---- pass 2: attention + out-proj + residual/GELU + LN2 + MLP ----
    tq = _pick_tile(S, q_tile)
    b_plist = [params["wo_t"], params["bo"], params["ln2_w"], params["ln2_b"],
               params["w1_t"], params["b1"], params["w2_t"], params["b2"]]
    b_pspecs = [pl.BlockSpec(p.shape, lambda b, qi, _nd=p.ndim: (0,) * _nd)
                for p in b_plist]
    b_bytes = 4 * (sum(int(p.size) for p in b_plist)
                   + 2 * (3 * tq * H + 2 * S * H)     # double-buffered x/q/out + k/v
                   + tq * H + tq * F + tq * S)        # scratch + live intermediates
    out = pl.pallas_call(
        functools.partial(_attn_mlp_kernel, num_heads=num_heads),
        out_shape=jax.ShapeDtypeStruct((B, S, H), x.dtype),
        grid=(B, S // tq),
        in_specs=[pl.BlockSpec((1, tq, H), lambda b, qi: (b, qi, 0)),   # x (residual)
                  pl.BlockSpec((1, tq, H), lambda b, qi: (b, qi, 0)),   # q tile
                  pl.BlockSpec((1, S, H), lambda b, qi: (b, 0, 0)),     # k (full seq)
                  pl.BlockSpec((1, S, H), lambda b, qi: (b, 0, 0))]     # v (full seq)
                 + b_pspecs,
        out_specs=pl.BlockSpec((1, tq, H), lambda b, qi: (b, qi, 0)),
        scratch_shapes=[pltpu.VMEM((tq, H), jnp.float32)],
        compiler_params=_compiler_params(b_bytes, ("parallel", "parallel")),
    )(x, q, k, v, *b_plist)
    return out


# --------------------------------------------------------------------------- #
# pure-JAX reference + params                                                  #
# --------------------------------------------------------------------------- #
def tester_layer_ref(x, params, num_heads):
    B, S, H = x.shape
    hd = H // num_heads

    def ln(v, w, b):
        mu = jnp.mean(v, axis=-1, keepdims=True)
        var = jnp.mean((v - mu) ** 2, axis=-1, keepdims=True)
        return (v - mu) / jnp.sqrt(var + 1e-5) * w + b

    residual = x
    xn = ln(x, params["ln1_w"], params["ln1_b"])
    qkv = xn @ params["wqkv_t"] + params["bqkv"]
    q, k, v = jnp.split(qkv, 3, axis=-1)
    q = q.reshape(B, S, num_heads, hd).transpose(0, 2, 1, 3)
    k = k.reshape(B, S, num_heads, hd).transpose(0, 2, 1, 3)
    v = v.reshape(B, S, num_heads, hd).transpose(0, 2, 1, 3)
    s = jnp.einsum("bhqd,bhkd->bhqk", q, k) / math.sqrt(hd)
    p = jax.nn.softmax(s, axis=-1)
    a = jnp.einsum("bhqk,bhkd->bhqd", p, v).transpose(0, 2, 1, 3).reshape(B, S, H)
    a = a @ params["wo_t"] + params["bo"]
    x2 = jax.nn.gelu(a + residual, approximate=False)
    residual2 = x2
    xn2 = ln(x2, params["ln2_w"], params["ln2_b"])
    h1 = jax.nn.gelu(xn2 @ params["w1_t"] + params["b1"], approximate=False)
    return jax.nn.gelu(h1 @ params["w2_t"] + params["b2"] + residual2, approximate=False)


def make_params(key, hidden_size, mlp_ratio):
    H = hidden_size
    F = int(hidden_size * mlp_ratio)
    ks = jax.random.split(key, 8)
    scale = 0.05
    # PyTorch Linear weight is (out, in); we pre-transpose to (in, out).
    wqkv = scale * jax.random.normal(ks[0], (3 * H, H), jnp.float32)
    wo = scale * jax.random.normal(ks[1], (H, H), jnp.float32)
    w1 = scale * jax.random.normal(ks[2], (F, H), jnp.float32)
    w2 = scale * jax.random.normal(ks[3], (H, F), jnp.float32)
    return {
        "ln1_w": jnp.ones((1, H), jnp.float32),
        "ln1_b": jnp.zeros((1, H), jnp.float32),
        "wqkv_t": wqkv.T,                                           # (H, 3H)
        "bqkv": scale * jax.random.normal(ks[4], (1, 3 * H), jnp.float32),
        "wo_t": wo.T,                                               # (H, H)
        "bo": scale * jax.random.normal(ks[5], (1, H), jnp.float32),
        "ln2_w": jnp.ones((1, H), jnp.float32),
        "ln2_b": jnp.zeros((1, H), jnp.float32),
        "w1_t": w1.T,                                               # (H, F)
        "b1": scale * jax.random.normal(ks[6], (1, F), jnp.float32),
        "w2_t": w2.T,                                               # (F, H)
        "b2": scale * jax.random.normal(ks[7], (1, H), jnp.float32),
    }


if __name__ == "__main__":
    batch, seq, hidden = 2, 8, 32
    num_heads, mlp_ratio = 4, 4

    key = jax.random.PRNGKey(0)
    kx, kp = jax.random.split(key)
    x = jax.random.normal(kx, (batch, seq, hidden), jnp.float32)
    params = make_params(kp, hidden, mlp_ratio)

    out = jax.block_until_ready(tester_layer(x, params, num_heads))
    ref = tester_layer_ref(x, params, num_heads)

    assert out.shape == (batch, seq, hidden)
    # Slightly looser tolerance than pure f32: softmax uses the EUP approx reciprocal.
    err = float(jnp.max(jnp.abs(out - ref)))
    assert jnp.allclose(out, ref, rtol=2e-3, atol=2e-3), err

    print("KERNEL_OK")
</pallas_src>

<mosaic_0001>
module attributes {stable_mosaic.version = 11 : i64} {
  func.func @_qkv_kernel(%arg0: i32, %arg1: i32, %arg2: memref<1x8x32xf32, #tpu.memory_space<vmem>>, %arg3: memref<1x32xf32, #tpu.memory_space<vmem>>, %arg4: memref<1x32xf32, #tpu.memory_space<vmem>>, %arg5: memref<32x96xf32, #tpu.memory_space<vmem>>, %arg6: memref<1x96xf32, #tpu.memory_space<vmem>>, %arg7: memref<1x8x32xf32, #tpu.memory_space<vmem>>, %arg8: memref<1x8x32xf32, #tpu.memory_space<vmem>>, %arg9: memref<1x8x32xf32, #tpu.memory_space<vmem>>) attributes {dimension_semantics = [#tpu.dimension_semantics<parallel>, #tpu.dimension_semantics<parallel>], iteration_bounds = array<i64: 2, 1>, scalar_prefetch = 0 : i64, scratch_operands = 0 : i64, tpu.core_type = #tpu.core_type<tc>, window_params = [{transform_indices = @transform_0, window_bounds = array<i64: 1, 8, 32>}, {pipeline_mode = #tpu.pipeline_mode<synchronous>, transform_indices = @transform_1, window_bounds = array<i64: 1, 32>}, {pipeline_mode = #tpu.pipeline_mode<synchronous>, transform_indices = @transform_2, window_bounds = array<i64: 1, 32>}, {pipeline_mode = #tpu.pipeline_mode<synchronous>, transform_indices = @transform_3, window_bounds = array<i64: 32, 96>}, {pipeline_mode = #tpu.pipeline_mode<synchronous>, transform_indices = @transform_4, window_bounds = array<i64: 1, 96>}, {transform_indices = @transform_5, window_bounds = array<i64: 1, 8, 32>}, {transform_indices = @transform_6, window_bounds = array<i64: 1, 8, 32>}, {transform_indices = @transform_7, window_bounds = array<i64: 1, 8, 32>}]} {
    %c0 = arith.constant 0 : index
    %c0_0 = arith.constant 0 : index
    %c0_1 = arith.constant 0 : index
    %0 = vector.load %arg2[%c0, %c0_0, %c0_1] : memref<1x8x32xf32, #tpu.memory_space<vmem>>, vector<1x8x32xf32>
    %1 = vector.shape_cast %0 : vector<1x8x32xf32> to vector<8x32xf32>
    %c0_2 = arith.constant 0 : index
    %c0_3 = arith.constant 0 : index
    %2 = vector.load %arg3[%c0_2, %c0_3] : memref<1x32xf32, #tpu.memory_space<vmem>>, vector<1x32xf32>
    %c0_4 = arith.constant 0 : index
    %c0_5 = arith.constant 0 : index
    %3 = vector.load %arg4[%c0_4, %c0_5] : memref<1x32xf32, #tpu.memory_space<vmem>>, vector<1x32xf32>
    %cst = arith.constant dense<0.000000e+00> : vector<8xf32>
    %4 = vector.multi_reduction <add>, %1, %cst [1] : vector<8x32xf32> to vector<8xf32>
    %5 = vector.shape_cast %4 : vector<8xf32> to vector<8x1xf32>
    %cst_6 = arith.constant 3.200000e+01 : f32
    %6 = vector.broadcast %cst_6 : f32 to vector<8x1xf32>
    %7 = arith.divf %5, %6 : vector<8x1xf32>
    %8 = vector.broadcast %7 : vector<8x1xf32> to vector<8x32xf32>
    %9 = arith.subf %1, %8 : vector<8x32xf32>
    %10 = arith.mulf %9, %9 : vector<8x32xf32>
    %cst_7 = arith.constant dense<0.000000e+00> : vector<8xf32>
    %11 = vector.multi_reduction <add>, %10, %cst_7 [1] : vector<8x32xf32> to vector<8xf32>
    %12 = vector.shape_cast %11 : vector<8xf32> to vector<8x1xf32>
    %cst_8 = arith.constant 3.200000e+01 : f32
    %13 = vector.broadcast %cst_8 : f32 to vector<8x1xf32>
    %14 = arith.divf %12, %13 : vector<8x1xf32>
    %15 = vector.broadcast %7 : vector<8x1xf32> to vector<8x32xf32>
    %16 = arith.subf %1, %15 : vector<8x32xf32>
    %cst_9 = arith.constant 9.99999974E-6 : f32
    %17 = vector.broadcast %cst_9 : f32 to vector<8x1xf32>
    %18 = arith.addf %14, %17 : vector<8x1xf32>
    %19 = math.rsqrt %18 : vector<8x1xf32>
    %20 = vector.broadcast %19 : vector<8x1xf32> to vector<8x32xf32>
    %21 = arith.mulf %16, %20 : vector<8x32xf32>
    %22 = vector.broadcast %2 : vector<1x32xf32> to vector<8x32xf32>
    %23 = arith.mulf %21, %22 : vector<8x32xf32>
    %24 = vector.broadcast %3 : vector<1x32xf32> to vector<8x32xf32>
    %25 = arith.addf %23, %24 : vector<8x32xf32>
    %c0_10 = arith.constant 0 : index
    %c0_11 = arith.constant 0 : index
    %26 = vector.load %arg5[%c0_10, %c0_11] : memref<32x96xf32, #tpu.memory_space<vmem>>, vector<32x96xf32>
    %cst_12 = arith.constant dense<0.000000e+00> : vector<8x96xf32>
    %27 = tpu.matmul %25, %26, %cst_12 {dimension_numbers = #tpu.dot_dimension_numbers<[1], [0], [0], [1], [0, 0, 1, 1], [], []>} : vector<8x32xf32>, vector<32x96xf32>, vector<8x96xf32> -> vector<8x96xf32>
    %c0_13 = arith.constant 0 : index
    %c0_14 = arith.constant 0 : index
    %28 = vector.load %arg6[%c0_13, %c0_14] : memref<1x96xf32, #tpu.memory_space<vmem>>, vector<1x96xf32>
    %29 = vector.broadcast %28 : vector<1x96xf32> to vector<8x96xf32>
    %30 = arith.addf %27, %29 : vector<8x96xf32>
    %31 = vector.extract_strided_slice %30 {offsets = [0, 0], sizes = [8, 32], strides = [1, 1]} : vector<8x96xf32> to vector<8x32xf32>
    %c0_15 = arith.constant 0 : index
    %c0_16 = arith.constant 0 : index
    %c0_17 = arith.constant 0 : index
    %32 = vector.load %arg7[%c0_15, %c0_16, %c0_17] : memref<1x8x32xf32, #tpu.memory_space<vmem>>, vector<1x8x32xf32>
    %33 = vector.shape_cast %32 : vector<1x8x32xf32> to vector<8x32xf32>
    %34 = vector.shape_cast %31 : vector<8x32xf32> to vector<1x8x32xf32>
    tpu.vector_store %arg7[%c0_15, %c0_16, %c0_17], %34 {strides = array<i32>} : memref<1x8x32xf32, #tpu.memory_space<vmem>>, vector<1x8x32xf32>,
    %35 = vector.extract_strided_slice %30 {offsets = [0, 32], sizes = [8, 32], strides = [1, 1]} : vector<8x96xf32> to vector<8x32xf32>
    %c0_18 = arith.constant 0 : index
    %c0_19 = arith.constant 0 : index
    %c0_20 = arith.constant 0 : index
    %36 = vector.load %arg8[%c0_18, %c0_19, %c0_20] : memref<1x8x32xf32, #tpu.memory_space<vmem>>, vector<1x8x32xf32>
    %37 = vector.shape_cast %36 : vector<1x8x32xf32> to vector<8x32xf32>
    %38 = vector.shape_cast %35 : vector<8x32xf32> to vector<1x8x32xf32>
    tpu.vector_store %arg8[%c0_18, %c0_19, %c0_20], %38 {strides = array<i32>} : memref<1x8x32xf32, #tpu.memory_space<vmem>>, vector<1x8x32xf32>,
    %39 = vector.extract_strided_slice %30 {offsets = [0, 64], sizes = [8, 32], strides = [1, 1]} : vector<8x96xf32> to vector<8x32xf32>
    %c0_21 = arith.constant 0 : index
    %c0_22 = arith.constant 0 : index
    %c0_23 = arith.constant 0 : index
    %40 = vector.load %arg9[%c0_21, %c0_22, %c0_23] : memref<1x8x32xf32, #tpu.memory_space<vmem>>, vector<1x8x32xf32>
    %41 = vector.shape_cast %40 : vector<1x8x32xf32> to vector<8x32xf32>
    %42 = vector.shape_cast %39 : vector<8x32xf32> to vector<1x8x32xf32>
    tpu.vector_store %arg9[%c0_21, %c0_22, %c0_23], %42 {strides = array<i32>} : memref<1x8x32xf32, #tpu.memory_space<vmem>>, vector<1x8x32xf32>,
    return
  }
  func.func @transform_0(%arg0: i32, %arg1: i32) -> (i32, i32, i32) {
    %c0_i32 = arith.constant 0 : i32
    %c0_i32_0 = arith.constant 0 : i32
    return %arg0, %arg1, %c0_i32 : i32, i32, i32
  }
  func.func @transform_1(%arg0: i32, %arg1: i32) -> (i32, i32) {
    %c0_i32 = arith.constant 0 : i32
    %c0_i32_0 = arith.constant 0 : i32
    %c0_i32_1 = arith.constant 0 : i32
    return %c0_i32, %c0_i32_0 : i32, i32
  }
  func.func @transform_2(%arg0: i32, %arg1: i32) -> (i32, i32) {
    %c0_i32 = arith.constant 0 : i32
    %c0_i32_0 = arith.constant 0 : i32
    %c0_i32_1 = arith.constant 0 : i32
    return %c0_i32, %c0_i32_0 : i32, i32
  }
  func.func @transform_3(%arg0: i32, %arg1: i32) -> (i32, i32) {
    %c0_i32 = arith.constant 0 : i32
    %c0_i32_0 = arith.constant 0 : i32
    %c0_i32_1 = arith.constant 0 : i32
    return %c0_i32, %c0_i32_0 : i32, i32
  }
  func.func @transform_4(%arg0: i32, %arg1: i32) -> (i32, i32) {
    %c0_i32 = arith.constant 0 : i32
    %c0_i32_0 = arith.constant 0 : i32
    %c0_i32_1 = arith.constant 0 : i32
    return %c0_i32, %c0_i32_0 : i32, i32
  }
  func.func @transform_5(%arg0: i32, %arg1: i32) -> (i32, i32, i32) {
    %c0_i32 = arith.constant 0 : i32
    %c0_i32_0 = arith.constant 0 : i32
    return %arg0, %arg1, %c0_i32 : i32, i32, i32
  }
  func.func @transform_6(%arg0: i32, %arg1: i32) -> (i32, i32, i32) {
    %c0_i32 = arith.constant 0 : i32
    %c0_i32_0 = arith.constant 0 : i32
    return %arg0, %arg1, %c0_i32 : i32, i32, i32
  }
  func.func @transform_7(%arg0: i32, %arg1: i32) -> (i32, i32, i32) {
    %c0_i32 = arith.constant 0 : i32
    %c0_i32_0 = arith.constant 0 : i32
    return %arg0, %arg1, %c0_i32 : i32, i32, i32
  }
}

</mosaic_0001>

<bundles_post_ra>
// kernel: tpu_custom_call.1
= control target key start
LH: loop header
LB: loop body
LE: loop exit
PB: predicated region body
PF: predicated region fallthrough
CT: control target
= control target key end

     0   :  { %s1385_s0 = inlined_call_operand.hbm [shape: f32[2,8,32], index: 0, kind: input, shape index: {}]   ;;  %s1386_s1 = inlined_call_operand.vmem [shape: f32[1,32], index: 1, kind: input, shape index: {}]   ;;  %s1387_s2 = inlined_call_operand.vmem [shape: f32[1,32], index: 2, kind: input, shape index: {}]   ;;  %s1388_s3 = inlined_call_operand.hbm [shape: f32[32,96], index: 3, kind: input, shape index: {}]   ;;  %s1389_s4 = inlined_call_operand.vmem [shape: f32[1,96], index: 4, kind: input, shape index: {}]   ;;  %s1390_s5 = inlined_call_operand.hbm [shape: f32[2,8,32], index: 5, kind: output, shape index: {0}]   ;;  %s1391_s6 = inlined_call_operand.hbm [shape: f32[2,8,32], index: 6, kind: output, shape index: {1}]   ;;  %s1392_s7 = inlined_call_operand.hbm [shape: f32[2,8,32], index: 7, kind: output, shape index: {2}]  }
   0x1   :  { %1398 = sst [smem:[#allocation16_spill]] %s1388_s3 }
   0x2   :  { %13 = vsyncpa [#allocation3], 0 }
   0x3   :  { %15 = vsyncpa [#allocation3 + $0x1], 0 }
   0x4   :  { %16 = vsyncpa [#allocation6], 0 }
   0x5   :  { %17 = vsyncpa [#allocation4], 0 }
   0x6   :  { %19 = vsyncpa [#allocation4 + $0x1], 0 }
   0x7   :  { %20 = vsyncpa [#allocation9], 0 }
   0x8   :  { %22 = vsyncpa [#allocation9 + $0x1], 0  ;;  %s1077_s24 = smov 0   ;;  %s1079_s25 = smov 0  }
   0x9   :  { %s1081_s26 = smov 0   ;;  %s1083_s27 = smov 0  }
   0xa   :  { %s1085_s28 = smov 0   ;;  %s1087_s29 = smov 0  }
   0xb LB: > { %s1108_s30 = sadd.s32 4294967295, %s1023_s29   ;;  %s1396_s8 = sadd.s32 4294967294, %s1023_s29   ;;  %s1023_s29 = sphi %s1087_s29, %s28_s29   ;;  %s1019_s28 = sphi %s1085_s28, %s1421_s28   ;;  %s1015_s27 = sphi %s1083_s27, %s1420_s27   ;;  %s1011_s26 = sphi %s1081_s26, %s1419_s26   ;;  %s1007_s25 = sphi %s1079_s25, %s1418_s25   ;;  %s1003_s24 = sphi %s1077_s24, %s1417_s24  }
   0xc   : > { %p62_p0 = scmp.ne.s32.totalorder %s1007_s25, %s1003_s24  ;;  %p1393_p1 = scmp.eq.s32.totalorder %s1108_s30, 0 }
   0xd   : > { %p178_p3 = scmp.eq.s32.totalorder %s1396_s8, 1  ;;  %p682_p5 = scmp.ge.s32.totalorder %s1023_s29, 1 }
   0xe   : > { %p1119_p4 = por %p1393_p1, %p62_p0  ;;  %p241_p7 = scmp.lt.s32.totalorder %s1023_s29, 3 }
   0xf   : > { %p1124_p6 = por %p178_p3, %p62_p0  ;;  %s1025_s12 = smov [#allocation5]  }
  0x10   : > { %s1399_s9 = scalar_select %p1119_p4, 1, 0 }
  0x11   : > { %s1400_s10 = scalar_select %p1124_p6, 1, 0 }
  0x12   : > { %p1129_p8 = pnand %p682_p5, %p241_p7  ;;  %s259_s13 = sshll.u32 %s1025_s12, 4  ;;  %s260_s13 = int_to_ptr.vmem [resolvable:$true] %s259_s13 }
  0x13   : > { %s40_s15 = sadd.s32 1, %s1019_s28  ;;  %s1403_s3 = sld [smem:[#allocation16_spill]] }
  0x14   : > { %s1401_s11 = scalar_select %p1129_p8, 1, 0 }
  0x15   : > { %p739_p9 = pneg %p1129_p8 }
  0x17   : > { %p1138_p11 = pnand %p739_p9, %p1393_p1 }
  0x19   : > { %s819_s18 = scalar_lea.hbm %s1403_s3, 512  ;;  %p821_p13 = pneg %p1138_p11 }
  0x1a   : > { %p820_p12 = scmp.ne.s32.totalorder %s1403_s3, %s819_s18  ;;  %p826_p5 = scmp.lt.u32.totalorder %s819_s18, %s1403_s3 }
  0x1c   : > { %p822_p0 = pnand %p821_p13, %p820_p12 }
  0x1e   : > { %p823_p3 = pneg %p822_p0 }
  0x20   : > { %p828_p7 = pnand %p826_p5, %p823_p3 }
  0x22   : > { %831 = shalt.err (!%p828_p7)
}
  0x23   : > { %s832_s23 = scalar_lea.vmem %s260_s13, 512  ;;  %p840_p2 = scmp.lt.s32.totalorder %s260_s13, %s260_s13 }
  0x24   : > { %p833_p9 = scmp.ne.s32.totalorder %s260_s13, %s832_s23  ;;  %p841_p6 = scmp.lt.s32.totalorder %s832_s23, %s832_s23 }
  0x26   : > { %p835_p10 = pnand %p833_p9, %p821_p13  ;;  %p842_p4 = por %p841_p6, %p840_p2 }
  0x28   : > { %p836_p1 = pneg %p835_p10 }
  0x2a   : > { %p843_p8 = pnand %p842_p4, %p836_p1 }
  0x2c   : > { %846 = shalt.err (!%p843_p8)
}
  0x2d   : > { %s1026_s12 = smov 128   ;;  %s1027_s16 = smov 8  }
  0x2e   : > { %742 = dma.hbm_to_vmem [thread:$0]  (!%p1138_p11), %s1403_s3, 512, %s260_s13, [#allocation6], %s1026_s12, %s1026_s12, %s1027_s16  }
  0x2f   : > { %p42_p1 = scmp.ge.s32.totalorder %s40_s15, 2  ;;  %s49_s19 = sadd.s32 1, %s1011_s26 }
  0x30   : > { %p56_p2 = scmp.ne.s32.totalorder %s1011_s26, %s1007_s25  ;;  %p57_p4 = scmp.eq.s32.totalorder %s1023_s29, 0 }
  0x31   : > { %s1423_s15 = smov (%p42_p1, %s40_s15), 0  ;;  %p1406_p8 = scmp.eq.s32.totalorder %s1108_s30, 1 }
  0x32   : > { %1404 = sst [smem:[#allocation15_spill]] %s1423_s15  ;;  %p1165_p6 = por %p57_p4, %p56_p2 }
  0x33   : > { %p1171_p10 = por %p1406_p8, %p56_p2  ;;  %s44_s14 = ssub.s32 %s1019_s28, %s1423_s15 }
  0x34   : > { %p758_p12 = scmp.lt.s32.totalorder %s1023_s29, 2  ;;  %p47_p11 = scmp.eq.s32.totalorder %s44_s14, 0 }
  0x35   : > { %s276_s13 = sand.u32 1, %s1011_s26   ;;  %s686_s12 = sshll.u32 %s1019_s28, 7 }
  0x36   : > { %s685_s22 = sshll.u32 %s276_s13, 3  ;;  %s1186_s18 = scalar_lea.hbm %s1385_s0, %s686_s12 }
  0x37   : > { %s1180_s23 = scalar_select %p47_p11, %s1011_s26, %s49_s19  }
  0x38   : > { %s280_s8 = scalar_lea.vmem [#allocation2], %s685_s22  ;;  %p1192_p13 = pnand %p758_p12, %p1165_p6 }
  0x39   : > { %s288_s3 = sshll.u32 %s280_s8, 4  ;;  %s277_s19 = scalar_lea.sflag [#allocation3], %s276_s13  ;;  %s1188_s3 = int_to_ptr.vmem [resolvable:$true] %s288_s3 }
  0x3a   : > { %s847_s15 = scalar_lea.hbm %s1186_s18, 128  ;;  %p849_p3 = pneg %p1192_p13 }
  0x3b   : > { %p848_p0 = scmp.ne.s32.totalorder %s1186_s18, %s847_s15  ;;  %s852_s12 = scalar_lea.hbm %s1385_s0, 256 }
  0x3c   : > { %p853_p9 = scmp.lt.u32.totalorder %s1186_s18, %s1385_s0  ;;  %p854_p1 = scmp.lt.u32.totalorder %s852_s12, %s847_s15 }
  0x3d   : > { %p850_p5 = pnand %p849_p3, %p848_p0  ;;  %p856_p4 = scmp.lt.u32.totalorder %s847_s15, %s1186_s18 }
  0x3e   : > { %p855_p2 = por %p854_p1, %p853_p9 }
  0x3f   : > { %p851_p7 = pneg %p850_p5 }
  0x40   : > { %p857_p6 = por %p856_p4, %p855_p2 }
  0x42   : > { %p858_p8 = pnand %p857_p6, %p851_p7 }
  0x44   : > { %861 = shalt.err (!%p858_p8)
}
  0x45   : > { %s862_s13 = scalar_lea.vmem %s1188_s3, 128  ;;  %s1028_s17 = smov [#allocation2]  }
  0x46   : > { %p863_p12 = scmp.ne.s32.totalorder %s1188_s3, %s862_s13  ;;  %s867_s22 = sshll.u32 %s1028_s17, 4  ;;  %s868_s22 = int_to_ptr.vmem [resolvable:$false] %s867_s22 }
  0x47   : > { %s869_s8 = scalar_lea.vmem %s868_s22, 256  ;;  %p870_p5 = scmp.lt.s32.totalorder %s1188_s3, %s868_s22 }
  0x48   : > { %p865_p11 = pnand %p863_p12, %p849_p3  ;;  %p871_p9 = scmp.lt.s32.totalorder %s869_s8, %s862_s13 }
  0x4a   : > { %p866_p0 = pneg %p865_p11  ;;  %p872_p1 = por %p871_p9, %p870_p5 }
  0x4c   : > { %p873_p2 = pnand %p872_p1, %p866_p0 }
  0x4e   : > { %876 = shalt.err (!%p873_p2)
}
  0x4f   : > { %746 = dma.hbm_to_vmem [thread:$0]  (!%p1192_p13), %s1186_s18, 128, %s1188_s3, %s277_s19  }
  0x50   : > { %p1409_p7 = scmp.ne.s32.totalorder %s1401_s11, 0 }
  0x51   : > { %s1224_s15 = sand.u32 (!%p1409_p7), 1, %s1007_s25   ;;  %p1410_p3 = scmp.ne.s32.totalorder (!%p1409_p7), %s1399_s9, 0 }
  0x52   : > { %297 = sbr.rel (%p1409_p7) target bundleno = 773 (0x305), region = 40  ;;  %s1227_s12 = sshll.u32 (!%p1409_p7), %s1224_s15, 3 }
  0x53   : > { %s300_s20 = scalar_lea.sflag (!%p1409_p7), [#allocation3], %s1224_s15  ;;  %s303_s16 = scalar_lea.vmem (!%p1409_p7), [#allocation2], %s1227_s12 }
  0x59   : > { %986 = dma.done.wait (%p1410_p3), %s300_s20, 128  }
  0x5a   : > { %988 = vsyncadd (%p1410_p3), %s300_s20, 4294967168  ;;  %p1411_p13 = scmp.eq.s32.totalorder %s1108_s30, 0 }
  0x5c   : > { %990 = dma.done.wait (%p1411_p13), [#allocation6], 512   ;;  %p1412_p4 = pmov %p1411_p13 }
  0x5d   : > { %vm351_vm0 = vcmask 261120   ;;  %v348_v0 = vld [vmem:[%s303_s16] sm:$0xff]  ;;  %v380_v7 = vld [vmem:[#allocation5] sm:$0xff]  ;;  %v381_v8 = vld [vmem:[#allocation5 + $0x8] sm:$0xff]  ;;  %v1029_v10 = vmov 0.0|0.0   ;;  %vm1030_vm1 = vmmov 0  }
  0x5e   : > { %992 = vsyncadd (%p1412_p4), [#allocation6], 4294966784  ;;  %v352_v1 = vsel %vm351_vm0, %v348_v0, 0.0  ;;  %v382_v9 = vld [vmem:[#allocation5 + $0x10] sm:$0xff]  ;;  %721 = vmatprep.subr.bf16.mxu0 %v1029_v10  ;;  %v722_v11 = vpack.c.bf16 %v381_v8, %v380_v7  ;;  %v383_v12 = vld [vmem:[#allocation5 + $0x18] sm:$0xff]  ;;  %v1031_v13 = vmov 0.0  }
  0x5f   : > { %353 = vadd.xlane.f32.xlu0 %v352_v1  ;;  %718 = vmatprep.mubr.msk.f32.mxu0 %vm1030_vm1, %v1031_v13  ;;  %v725_v14 = vpack.c.bf16 %v383_v12, %v382_v9  ;;  %v693_v19 = vld [vmem:[%s1386_s1] ss:$0 sm:$0xff]  ;;  %s1252_s13 = sshll.u32 %s1015_s27, 7  ;;  %s333_s17 = scalar_lea.vmem [#allocation7], %s1227_s12 }
  0x60   : > { %723 = vmatpush3.bf16.msra.mxu0 %v722_v11  ;;  %v694_v21 = vld [vmem:[%s1387_s2] ss:$0 sm:$0xff]  ;;  %s499_s22 = sshll.u32 %s333_s17, 4  ;;  %s1259_s16 = scalar_lea.hbm %s1390_s5, %s1252_s13  ;;  %s1261_s22 = int_to_ptr.vmem [resolvable:$true] %s499_s22 }
  0x61   : > { %724 = vmatprep.subr.bf16.mxu0 %v1029_v10  ;;  %v695_v24 = vld [vmem:[%s1389_s4] ss:$0 sm:$0xff]  ;;  %s1032_s3 = smov 96   ;;  %s475_s27 = scalar_lea.sflag [#allocation4], %s1224_s15 }
  0x62   : > { %s877_s9 = scalar_lea.vmem %s1261_s22, 128  ;;  %s1033_s11 = smov [#allocation7]  }
  0x63   : > { %p878_p6 = scmp.ne.s32.totalorder %s1261_s22, %s877_s9  ;;  %s881_s18 = sshll.u32 %s1033_s11, 4  ;;  %s882_s18 = int_to_ptr.vmem [resolvable:$false] %s881_s18 }
  0x64   : > { %726 = vmatpush3.bf16.msra.mxu0 %v725_v14  ;;  %s883_s14 = scalar_lea.vmem %s882_s18, 256  ;;  %p884_p11 = scmp.lt.s32.totalorder %s1261_s22, %s882_s18 }
  0x65   : > { %p879_p8 = pnand %p878_p6, %p1171_p10  ;;  %p885_p0 = scmp.lt.s32.totalorder %s883_s14, %s877_s9 }
  0x67   : > { %p880_p12 = pneg %p879_p8  ;;  %p886_p5 = por %p885_p0, %p884_p11 }
  0x69   : > { %p887_p9 = pnand %p886_p5, %p880_p12 }
  0xec   : > { %v354_v2 = vpop.xlane.xlu0 %353 }
  0xed   : > { %v356_v3 = vmul.f32 0.03125, %v354_v2 }
  0xef   : > { %v357_v4 = vsub.f32 %v348_v0, %v356_v3 }
  0xf1   : > { %v358_v5 = vmul.f32 %v357_v4, %v357_v4 }
  0xf3   : > { %v359_v6 = vsel %vm351_vm0, %v358_v5, 0.0 }
  0xf4   : > { %360 = vadd.xlane.f32.xlu0 %v359_v6 }
 0x181   : > { %v361_v15 = vpop.xlane.xlu0 %360 }
 0x182   : > { %v362_v16 = vmul.f32 0.03125, %v361_v15 }
 0x184   : > { %v363_v17 = vadd.f32 1e-05, %v362_v16 }
 0x186   : > { %817 = vrsqrt.f32 %v363_v17 }
 0x190   : > { %v818_v18 = vpop.eup %817 }
 0x191   : > { %v365_v20 = vmul.f32 %v818_v18, %v357_v4 }
 0x193   : > { %v372_v22 = vmul.f32 %v693_v19, %v365_v20 }
 0x195   : > { %v379_v23 = vadd.f32 %v694_v21, %v372_v22 }
 0x197   : > { %719 = vmatmul.mubr.msk.f32.vlgmr.msra.gmra.mrb[0].mxu0 %vm351_vm0, %v379_v23 }
 0x26a   : > { %v460_v25 = vpop.f32.mrb[0].mxu0 }
 0x26b   : > { %v461_v26 = vadd.f32 %v695_v24, %v460_v25  ;;  %v720_v27 = vpop.f32.mrb[1].mxu0 }
 0x26d   : > { %466 = vrot.lane.b32.xlu1 %v461_v26, %s1032_s3  ;;  %464 = vst.msk [vmem:[%s333_s17] sm:$0xff] %vm351_vm0, %v461_v26 }
 0x26e   : > { %890 = shalt.err (!%p887_p9)
}
 0x26f   : > { %s891_s15 = scalar_lea.hbm %s1259_s16, 128  ;;  %s895_s8 = scalar_lea.hbm %s1390_s5, 256 }
 0x270   : > { %p892_p1 = scmp.ne.s32.totalorder %s1259_s16, %s891_s15  ;;  %p896_p3 = scmp.lt.u32.totalorder %s1259_s16, %s1390_s5 }
 0x271   : > { %p897_p13 = scmp.lt.u32.totalorder %s895_s8, %s891_s15  ;;  %p899_p6 = scmp.lt.u32.totalorder %s891_s15, %s1259_s16 }
 0x272   : > { %p893_p2 = pnand %p892_p1, %p1171_p10 }
 0x273   : > { %p898_p4 = por %p897_p13, %p896_p3 }
 0x274   : > { %p894_p7 = pneg %p893_p2 }
 0x275   : > { %p900_p8 = por %p899_p6, %p898_p4 }
 0x277   : > { %p901_p12 = pnand %p900_p8, %p894_p7 }
 0x279   : > { %904 = shalt.err (!%p901_p12)
}
 0x27a   : > { %733 = dma.vmem_to_hbm [thread:$0]  (%p1171_p10), %s1261_s22, 128, %s1259_s16, %s475_s27  }
 0x27b   : > { %s1034_s9 = smov 64   ;;  %s479_s11 = sand.u32 1, %s1108_s30  }
 0x27c   : > { %470 = vrot.lane.b32.xlu1 %v461_v26, %s1034_s9  ;;  %s340_s18 = scalar_lea.vmem [#allocation8], %s1227_s12  ;;  %s1292_s17 = scalar_lea.hbm %s1391_s6, %s1252_s13 }
 0x27d   : > { %s513_s14 = sshll.u32 %s340_s18, 4  ;;  %s347_s8 = scalar_lea.vmem [#allocation10], %s1227_s12  ;;  %s1294_s14 = int_to_ptr.vmem [resolvable:$true] %s513_s14 }
 0x27e   : > { %s1299_s20 = sshll.u32 %s347_s8, 4  ;;  %s1302_s30 = scalar_lea.sflag [#allocation9], %s479_s11  ;;  %s1333_s20 = int_to_ptr.vmem [resolvable:$true] %s1299_s20 }
 0x27f   : > { %s905_s22 = scalar_lea.vmem %s1294_s14, 128  ;;  %s1035_s16 = smov [#allocation8]  }
 0x280   : > { %p906_p11 = scmp.ne.s32.totalorder %s1294_s14, %s905_s22  ;;  %s909_s27 = sshll.u32 %s1035_s16, 4  ;;  %s910_s27 = int_to_ptr.vmem [resolvable:$false] %s909_s27 }
 0x281   : > { %s911_s3 = scalar_lea.vmem %s910_s27, 256  ;;  %p912_p9 = scmp.lt.s32.totalorder %s1294_s14, %s910_s27 }
 0x282   : > { %p907_p0 = pnand %p906_p11, %p1171_p10  ;;  %p913_p1 = scmp.lt.s32.totalorder %s911_s3, %s905_s22 }
 0x284   : > { %p908_p5 = pneg %p907_p0  ;;  %p914_p2 = por %p913_p1, %p912_p9 }
 0x286   : > { %p915_p7 = pnand %p914_p2, %p908_p5 }
 0x2df   : > { %v467_v28 = vpop.permute.xlu1 %466 }
 0x2e0   : > { %469 = vst.msk [vmem:[%s340_s18] sm:$0xff] %vm351_vm0, %v467_v28 }
 0x2e1   : > { %918 = shalt.err (!%p915_p7)
}
 0x2e2   : > { %s919_s9 = scalar_lea.hbm %s1292_s17, 128  ;;  %s923_s15 = scalar_lea.hbm %s1391_s6, 256 }
 0x2e3   : > { %p920_p3 = scmp.ne.s32.totalorder %s1292_s17, %s919_s9  ;;  %p924_p6 = scmp.lt.u32.totalorder %s1292_s17, %s1391_s6 }
 0x2e4   : > { %p925_p8 = scmp.lt.u32.totalorder %s923_s15, %s919_s9  ;;  %p927_p11 = scmp.lt.u32.totalorder %s919_s9, %s1292_s17 }
 0x2e5   : > { %p921_p13 = pnand %p920_p3, %p1171_p10 }
 0x2e6   : > { %p926_p12 = por %p925_p8, %p924_p6 }
 0x2e7   : > { %p922_p4 = pneg %p921_p13 }
 0x2e8   : > { %p928_p0 = por %p927_p11, %p926_p12 }
 0x2ea   : > { %p929_p5 = pnand %p928_p0, %p922_p4 }
 0x2ec   : > { %932 = shalt.err (!%p929_p5)
}
 0x2ed   : > { %734 = dma.vmem_to_hbm [thread:$0]  (%p1171_p10), %s1294_s14, 128, %s1292_s17, %s1302_s30  }
 0x2ee   : > { %s1330_s3 = scalar_lea.hbm %s1392_s7, %s1252_s13  ;;  %v471_v29 = vpop.permute.xlu1 %470  ;;  %s933_s9 = scalar_lea.vmem %s1333_s20, 128 }
 0x2ef   : > { %473 = vst.msk [vmem:[%s347_s8] sm:$0xff] %vm351_vm0, %v471_v29  ;;  %p934_p9 = scmp.ne.s32.totalorder %s1333_s20, %s933_s9  ;;  %s1036_s14 = smov [#allocation10]  }
 0x2f0   : > { %s937_s17 = sshll.u32 %s1036_s14, 4  ;;  %s938_s17 = int_to_ptr.vmem [resolvable:$false] %s937_s17 }
 0x2f1   : > { %p935_p1 = pnand %p934_p9, %p1171_p10  ;;  %s939_s11 = scalar_lea.vmem %s938_s17, 256 }
 0x2f2   : > { %p940_p7 = scmp.lt.s32.totalorder %s1333_s20, %s938_s17  ;;  %p941_p3 = scmp.lt.s32.totalorder %s939_s11, %s933_s9 }
 0x2f3   : > { %p936_p2 = pneg %p935_p1 }
 0x2f4   : > { %p942_p13 = por %p941_p3, %p940_p7 }
 0x2f6   : > { %p943_p4 = pnand %p942_p13, %p936_p2 }
 0x2f8   : > { %946 = shalt.err (!%p943_p4)
}
 0x2f9   : > { %s947_s12 = scalar_lea.hbm %s1330_s3, 128  ;;  %s951_s18 = scalar_lea.hbm %s1392_s7, 256 }
 0x2fa   : > { %p948_p6 = scmp.ne.s32.totalorder %s1330_s3, %s947_s12  ;;  %p952_p11 = scmp.lt.u32.totalorder %s1330_s3, %s1392_s7 }
 0x2fb   : > { %p953_p0 = scmp.lt.u32.totalorder %s951_s18, %s947_s12  ;;  %p955_p9 = scmp.lt.u32.totalorder %s947_s12, %s1330_s3 }
 0x2fc   : > { %p949_p8 = pnand %p948_p6, %p1171_p10 }
 0x2fd   : > { %p954_p5 = por %p953_p0, %p952_p11 }
 0x2fe   : > { %p950_p12 = pneg %p949_p8 }
 0x2ff   : > { %p956_p1 = por %p955_p9, %p954_p5 }
 0x301   : > { %p957_p2 = pnand %p956_p1, %p950_p12 }
 0x303   : > { %960 = shalt.err (!%p957_p2)
}
 0x304   : > { %735 = dma.vmem_to_hbm [thread:$0]  (%p1171_p10), %s1333_s20, 128, %s1330_s3, %s1302_s30  }
 0x305 PF: > { %s539_s16 = sand.u32 1, %s1003_s24   ;;  %p1413_p7 = scmp.ne.s32.totalorder %s1400_s10, 0 }
 0x306   : > { %p1414_p3 = scmp.ge.s32.totalorder %s1023_s29, 2  ;;  %s540_s22 = scalar_lea.sflag [#allocation4], %s539_s16 }
 0x308   : > { %p748_p13 = pnand %p1414_p3, %p1413_p7 }
 0x30a   : > { %994 = dma.done.wait (!%p748_p13), %s540_s22, 128  }
 0x30b   : > { %996 = vsyncadd (!%p748_p13), %s540_s22, 4294967168  ;;  %s1415_s27 = sadd.s32 4294967294, %s1023_s29  }
 0x30c   : > { %s548_s9 = sand.u32 1, %s1415_s27  }
 0x30d   : > { %s549_s14 = scalar_lea.sflag [#allocation9], %s548_s9 }
 0x30e   : > { %998 = dma.done.wait (!%p748_p13), %s549_s14, 256  }
 0x30f   : > { %1000 = vsyncadd (!%p748_p13), %s549_s14, 4294967040  ;;  %s28_s29 = sadd.s32 1, %s1023_s29   ;;  %s1416_s21 = sld [smem:[#allocation15_spill]] }
 0x310   : > { %p25_p10 = scmp.ge.s32.totalorder %s28_s29, 4   ;;  %s1417_s24 = smov %s1007_s25 }
 0x311   : > { %s1418_s25 = smov %s1011_s26  ;;  %s1419_s26 = smov %s1180_s23 }
 0x312   : > { %s1420_s27 = smov %s1019_s28  ;;  %27 = sbr.rel (!%p25_p10) target bundleno = 11 (0xb), region = 121 }
 0x315   : > { %s1421_s28 = smov %s1416_s21 }
 0x319   :  { %563 = vsyncpa [#allocation3], 1 }
 0x31a   :  { %565 = vsyncpa [#allocation3 + $0x1], 1 }
 0x31b   :  { %566 = vsyncpa [#allocation6], 1 }
 0x31c   :  { %567 = vsyncpa [#allocation4], 1 }
 0x31d   :  { %569 = vsyncpa [#allocation4 + $0x1], 1 }
 0x31e   :  { %570 = vsyncpa [#allocation9], 1 }
 0x31f   :  { %572 = vsyncpa [#allocation9 + $0x1], 1 }

</bundles_post_ra>
